<compile_context>
chip_gen: v7x
topology: tpu7x:2x2x1
jax: 0.10.0
libtpu: 0.0.40
codegen_flags: <defaults>
</compile_context>

<pallas_src>
import functools
import warnings

import jax
import jax.numpy as jnp
from jax.experimental import pallas as pl
from jax.experimental.pallas import tpu as pltpu


def _round_up(x, m):
    return ((x + m - 1) // m) * m


def _cdiv(a, b):
    return -(-a // b)


# --------------------------------------------------------------------------- kernel
def _fused_dnn_kernel(*refs, num_linear, add_plan, live):
    """Whole DNN forward for one batch row-tile.

    refs = (x_ref, w_0..w_{L-1}, b_0..b_{L-1}, o_ref)
      x_ref : (TM, Pin0)       bf16 -- feature-padded input rows
      w_l   : (Pin_l, Pout_l)  bf16 -- per-layer padded, pre-transposed [in, out]
      b_l   : (1, Pout_l)      f32
      o_ref : (TM, Pout_last)  f32

    Zero padding is preserved through matmul -> +bias -> tanh -> residual adds
    (padded weight rows/cols and bias lanes are 0, tanh(0)=0), so the logical
    (unpadded) result is exact.  Only residual slots referenced by a later layer
    (`live`) are kept on-chip, shortening live ranges in the unrolled chain.
    """
    x_ref = refs[0]
    w_refs = refs[1:1 + num_linear]
    b_refs = refs[1 + num_linear:1 + 2 * num_linear]
    o_ref = refs[1 + 2 * num_linear]

    cur = x_ref[...]                                    # bf16; goes straight to the MXU
    residuals = {0: cur.astype(jnp.float32)} if 0 in live else {}
    for l in range(num_linear):
        w = w_refs[l][...]
        lhs = cur if cur.dtype == w.dtype else cur.astype(w.dtype)
        y = jnp.dot(lhs, w, preferred_element_type=jnp.float32)   # bf16 x bf16 -> f32
        y = y + b_refs[l][...]                          # (1, Pout) broadcasts over rows
        y = jnp.tanh(y)                                 # f32 tanh (v5e has no bf16 EUP)
        for k in add_plan[l]:                           # statically resolved residuals
            y = y + residuals[k]
        cur = y
        if (l + 1) in live:
            residuals[l + 1] = cur
    o_ref[...] = cur.astype(o_ref.dtype)


# --------------------------------------------------------------- policies / wrapper
_SINGLE_BUFFER_WEIGHTS = [True]   # flipped off once if this jax rejects pl.Buffered(1)


def _tiling_policy():
    """(row-tile cap, multi_core hint) per TPU generation."""
    cap, multi_core = 256, True                        # conservative default (v7x-like)
    try:
        kind = jax.devices()[0].device_kind.lower()
        if ("v5 lite" in kind) or ("v5e" in kind) or ("v6" in kind):
            cap, multi_core = 512, False               # 1 TensorCore/chip, 128 MiB VMEM
    except Exception:
        pass
    return cap, multi_core


def _pick_row_tile(batch, cap, multi_core):
    """Balanced row tile: minimal zero-pad rows; >=2 grid steps on multi-core parts."""
    min_tiles = 2 if (multi_core and batch >= 16) else 1
    tiles = max(min_tiles, _cdiv(batch, cap))
    return _round_up(max(_cdiv(batch, tiles), 8), 8)


def _vmem_limit_bytes(need):
    """Raise the scoped-VMEM limit (v5e default is 16 MiB) with headroom below the
    physical capacity (v7x has only 64 MiB per core)."""
    try:
        phys = int(pltpu.get_tpu_info().vmem_capacity_bytes)
    except Exception:
        phys = 64 << 20                                # most conservative (v7x)
    cap = max(phys - (12 << 20), 16 << 20)             # keep compiler-scratch headroom
    return int(min(max(need + (8 << 20), 32 << 20), cap))


def _vmem_need_bytes(tm, pin0, w_shapes, out_pad_width, live_widths, single_buffer):
    wbuf = 1 if single_buffer else 2
    need = 2 * tm * pin0 * 2                           # bf16 x tile (double-buffered)
    need += 2 * tm * out_pad_width * 4                 # f32 out tile (double-buffered)
    for pi, po in w_shapes:
        need += wbuf * (pi * po * 2 + po * 4)          # weight (bf16) + bias (f32)
    widest = max([po for _, po in w_shapes] + [pin0])
    need += tm * widest * 4                            # running activation
    need += sum(tm * w * 4 for w in live_widths)       # live residual history
    return need


def fused_dnn_forward(x_pad, weights, biases, *, add_plan, live, tm, out_pad_width):
    """Single pallas_call for the whole network, tiled over batch rows only."""
    batch_pad, pin0 = x_pad.shape
    num_linear = len(weights)
    grid_rows = batch_pad // tm
    w_shapes = [tuple(w.shape) for w in weights]
    live_widths = [pin0 if j == 0 else w_shapes[j - 1][1] for j in sorted(live)]

    kernel = functools.partial(
        _fused_dnn_kernel, num_linear=num_linear,
        add_plan=tuple(tuple(a) for a in add_plan), live=frozenset(live))

    def run(single_buffer):
        const_kw = {"pipeline_mode": pl.Buffered(1)} if single_buffer else {}
        in_specs = [pl.BlockSpec((tm, pin0), lambda i: (i, 0))]
        in_specs += [pl.BlockSpec(w.shape, lambda i: (0, 0), **const_kw) for w in weights]
        in_specs += [pl.BlockSpec(b.shape, lambda i: (0, 0), **const_kw) for b in biases]
        need = _vmem_need_bytes(tm, pin0, w_shapes, out_pad_width, live_widths,
                                single_buffer)
        return pl.pallas_call(
            kernel,
            grid=(grid_rows,),
            in_specs=in_specs,
            out_specs=pl.BlockSpec((tm, out_pad_width), lambda i: (i, 0)),
            out_shape=jax.ShapeDtypeStruct((batch_pad, out_pad_width), jnp.float32),
            compiler_params=pltpu.CompilerParams(
                dimension_semantics=("parallel",),
                vmem_limit_bytes=_vmem_limit_bytes(need)),
        )(x_pad, *weights, *biases)

    if _SINGLE_BUFFER_WEIGHTS[0]:
        try:
            return run(True)
        except Exception:
            # This jax build rejects pl.Buffered(1) on pallas_call BlockSpecs; fall
            # back to default (double-buffered) constant-index weight specs.
            _SINGLE_BUFFER_WEIGHTS[0] = False
    return run(False)


# --------------------------------------------------------------------------- module
class DNNPallas:
    """JAX/Pallas port of the PyTorch DNN with residual links (whole net = 1 kernel)."""

    def __init__(self, layers, connections, key, weight_dtype=jnp.bfloat16):
        if len(connections) != len(layers):
            raise ValueError("Length of connections must match the number of layers")
        self.layers = list(layers)
        self.connections = list(connections)
        self.num_layers = len(layers)
        # torch builds len(layers)-1 Linears; zip(linears, connections) silently drops
        # the trailing `connections` entry -- mirrored here.
        self.num_linear = self.num_layers - 1

        # Per-layer lane-dense padded widths (each rounded up to 128 independently).
        self.pad = [_round_up(max(w, 1), 128) for w in self.layers]
        self.pin0 = self.pad[0]
        self.pout_last = self.pad[self.num_linear]

        # Deterministic init mimicking torch.nn.Linear: U(-1/sqrt(fan_in), 1/sqrt(fan_in)).
        self.params = []      # unpadded (w[in,out] bf16, b[out] f32) for the reference
        self.w_list, self.b_list = [], []
        for i in range(self.num_linear):
            fan_in, fan_out = self.layers[i], self.layers[i + 1]
            pin, pout = self.pad[i], self.pad[i + 1]
            key, kw, kb = jax.random.split(key, 3)
            bound = 1.0 / float(fan_in) ** 0.5
            w = jax.random.uniform(kw, (fan_out, fan_in), jnp.float32, -bound, bound)
            b = jax.random.uniform(kb, (fan_out,), jnp.float32, -bound, bound)
            w_t = w.T.astype(weight_dtype)             # [in, out]; bf16 in / f32 accum
            self.params.append((w_t, b))
            self.w_list.append(
                jnp.zeros((pin, pout), weight_dtype).at[:fan_in, :fan_out].set(w_t))
            self.b_list.append(
                jnp.zeros((1, pout), jnp.float32).at[0, :fan_out].set(b))

        # Statically resolve which residuals are added at each layer (torch checks
        # shape equality at runtime and warns+skips on mismatch; widths are static
        # here so the plan is baked into the kernel), and which slots must stay live.
        self.add_plan = []
        for i in range(self.num_linear):
            out_width = self.layers[i + 1]
            hist_widths = [self.layers[j] for j in range(i + 1)]
            adds = []
            for k in self.connections[i]:
                kk = k if k >= 0 else len(hist_widths) + k
                if kk < 0 or kk >= len(hist_widths):
                    raise IndexError(f"connection index {k} out of range at layer {i}")
                if hist_widths[kk] == out_width:
                    adds.append(kk)
                else:
                    warnings.warn(
                        f"Residual shape mismatch at layer {i + 1}: residual {k} "
                        f"(width {hist_widths[kk]}) cannot be added to width "
                        f"{out_width}; skipped.", RuntimeWarning)
            self.add_plan.append(tuple(adds))
        self.live = frozenset(k for adds in self.add_plan for k in adds)

    def __call__(self, x):
        batch, din = x.shape
        if din != self.layers[0]:
            raise ValueError(f"expected input width {self.layers[0]}, got {din}")
        cap, multi_core = _tiling_policy()
        tm = _pick_row_tile(batch, cap, multi_core)
        batch_pad = _cdiv(batch, tm) * tm
        # bf16 input (halves x DMA; it is cast to bf16 for the MXU anyway); one fused
        # pad op instead of a full-size f32 zeros + scatter materialization.
        x_pad = jnp.pad(x.astype(jnp.bfloat16),
                        ((0, batch_pad - batch), (0, self.pin0 - din)))
        out_pad = fused_dnn_forward(
            x_pad, self.w_list, self.b_list, add_plan=self.add_plan, live=self.live,
            tm=tm, out_pad_width=self.pout_last)
        return out_pad[:batch, :self.layers[self.num_linear]]


# ------------------------------------------------------------------------ reference
def _reference(x, model):
    """Plain-JAX mirror of the torch forward (same bf16 weights / bf16 input /
    f32 accumulation as the kernel)."""
    cur = x.astype(jnp.bfloat16).astype(jnp.float32)
    residual = [cur]
    for i in range(model.num_linear):
        w, b = model.params[i]
        y = jnp.dot(cur.astype(w.dtype), w, preferred_element_type=jnp.float32) + b
        y = jnp.tanh(y)
        for k in model.connections[i]:
            r = residual[k]
            if r.shape == y.shape:
                y = y + r
        cur = y
        residual.append(cur)
    return cur


if __name__ == "__main__":
    key = jax.random.PRNGKey(0)

    # Config 1: uniform widths + residual links, tiny batch (single row tile).
    key, k1, kx1 = jax.random.split(key, 3)
    layers1 = [32, 32, 32, 32]
    conns1 = [[], [0], [0, 1], []]       # last entry dropped by zip, as in torch
    m1 = DNNPallas(layers1, conns1, k1)
    x1 = jax.random.normal(kx1, (8, layers1[0]), jnp.float32)
    out1 = jax.block_until_ready(m1(x1))
    ref1 = _reference(x1, m1)
    assert out1.shape == ref1.shape == (8, layers1[-1])
    assert jnp.allclose(out1, ref1, atol=2e-3, rtol=2e-3), (
        float(jnp.max(jnp.abs(out1 - ref1))))

    # Config 2: heterogeneous widths (per-layer padding, no global-max pad), a
    # residual link between matching-width layers, and batch >= 16 so multi-core
    # parts get >=2 row tiles; the batch remainder is padded inside the wrapper.
    key, k2, kx2 = jax.random.split(key, 3)
    layers2 = [24, 160, 96, 160, 64]
    conns2 = [[], [], [1], [], []]
    m2 = DNNPallas(layers2, conns2, k2)
    x2 = jax.random.normal(kx2, (20, layers2[0]), jnp.float32)
    out2 = jax.block_until_ready(m2(x2))
    ref2 = _reference(x2, m2)
    assert out2.shape == ref2.shape == (20, layers2[-1])
    assert jnp.allclose(out2, ref2, atol=2e-3, rtol=2e-3), (
        float(jnp.max(jnp.abs(out2 - ref2))))

    print("KERNEL_OK")
</pallas_src>

<mosaic_0001>
module attributes {stable_mosaic.version = 11 : i64} {
  func.func @_fused_dnn_kernel(%arg0: i32, %arg1: memref<8x128xbf16, #tpu.memory_space<vmem>>, %arg2: memref<128x128xbf16, #tpu.memory_space<vmem>>, %arg3: memref<128x128xbf16, #tpu.memory_space<vmem>>, %arg4: memref<128x128xbf16, #tpu.memory_space<vmem>>, %arg5: memref<1x128xf32, #tpu.memory_space<vmem>>, %arg6: memref<1x128xf32, #tpu.memory_space<vmem>>, %arg7: memref<1x128xf32, #tpu.memory_space<vmem>>, %arg8: memref<8x128xf32, #tpu.memory_space<vmem>>) attributes {dimension_semantics = [#tpu.dimension_semantics<parallel>], iteration_bounds = array<i64: 1>, scalar_prefetch = 0 : i64, scratch_operands = 0 : i64, tpu.core_type = #tpu.core_type<tc>, window_params = [{transform_indices = @transform_0, window_bounds = array<i64: 8, 128>}, {pipeline_mode = #tpu.pipeline_mode<synchronous>, transform_indices = @transform_1, window_bounds = array<i64: 128, 128>}, {pipeline_mode = #tpu.pipeline_mode<synchronous>, transform_indices = @transform_2, window_bounds = array<i64: 128, 128>}, {pipeline_mode = #tpu.pipeline_mode<synchronous>, transform_indices = @transform_3, window_bounds = array<i64: 128, 128>}, {pipeline_mode = #tpu.pipeline_mode<synchronous>, transform_indices = @transform_4, window_bounds = array<i64: 1, 128>}, {pipeline_mode = #tpu.pipeline_mode<synchronous>, transform_indices = @transform_5, window_bounds = array<i64: 1, 128>}, {pipeline_mode = #tpu.pipeline_mode<synchronous>, transform_indices = @transform_6, window_bounds = array<i64: 1, 128>}, {transform_indices = @transform_7, window_bounds = array<i64: 8, 128>}]} {
    %c0 = arith.constant 0 : index
    %c0_0 = arith.constant 0 : index
    %0 = vector.load %arg1[%c0, %c0_0] : memref<8x128xbf16, #tpu.memory_space<vmem>>, vector<8x128xbf16>
    %1 = arith.extf %0 : vector<8x128xbf16> to vector<8x128xf32>
    %c0_1 = arith.constant 0 : index
    %c0_2 = arith.constant 0 : index
    %2 = vector.load %arg2[%c0_1, %c0_2] : memref<128x128xbf16, #tpu.memory_space<vmem>>, vector<128x128xbf16>
    %cst = arith.constant dense<0.000000e+00> : vector<8x128xf32>
    %3 = tpu.matmul %0, %2, %cst {dimension_numbers = #tpu.dot_dimension_numbers<[1], [0], [0], [1], [0, 0, 1, 1], [], []>} : vector<8x128xbf16>, vector<128x128xbf16>, vector<8x128xf32> -> vector<8x128xf32>
    %c0_3 = arith.constant 0 : index
    %c0_4 = arith.constant 0 : index
    %4 = vector.load %arg5[%c0_3, %c0_4] : memref<1x128xf32, #tpu.memory_space<vmem>>, vector<1x128xf32>
    %5 = vector.broadcast %4 : vector<1x128xf32> to vector<8x128xf32>
    %6 = arith.addf %3, %5 : vector<8x128xf32>
    %7 = math.tanh %6 : vector<8x128xf32>
    %c0_5 = arith.constant 0 : index
    %c0_6 = arith.constant 0 : index
    %8 = vector.load %arg3[%c0_5, %c0_6] : memref<128x128xbf16, #tpu.memory_space<vmem>>, vector<128x128xbf16>
    %9 = arith.truncf %7 : vector<8x128xf32> to vector<8x128xbf16>
    %cst_7 = arith.constant dense<0.000000e+00> : vector<8x128xf32>
    %10 = tpu.matmul %9, %8, %cst_7 {dimension_numbers = #tpu.dot_dimension_numbers<[1], [0], [0], [1], [0, 0, 1, 1], [], []>} : vector<8x128xbf16>, vector<128x128xbf16>, vector<8x128xf32> -> vector<8x128xf32>
    %c0_8 = arith.constant 0 : index
    %c0_9 = arith.constant 0 : index
    %11 = vector.load %arg6[%c0_8, %c0_9] : memref<1x128xf32, #tpu.memory_space<vmem>>, vector<1x128xf32>
    %12 = vector.broadcast %11 : vector<1x128xf32> to vector<8x128xf32>
    %13 = arith.addf %10, %12 : vector<8x128xf32>
    %14 = math.tanh %13 : vector<8x128xf32>
    %15 = arith.addf %14, %1 : vector<8x128xf32>
    %c0_10 = arith.constant 0 : index
    %c0_11 = arith.constant 0 : index
    %16 = vector.load %arg4[%c0_10, %c0_11] : memref<128x128xbf16, #tpu.memory_space<vmem>>, vector<128x128xbf16>
    %17 = arith.truncf %15 : vector<8x128xf32> to vector<8x128xbf16>
    %cst_12 = arith.constant dense<0.000000e+00> : vector<8x128xf32>
    %18 = tpu.matmul %17, %16, %cst_12 {dimension_numbers = #tpu.dot_dimension_numbers<[1], [0], [0], [1], [0, 0, 1, 1], [], []>} : vector<8x128xbf16>, vector<128x128xbf16>, vector<8x128xf32> -> vector<8x128xf32>
    %c0_13 = arith.constant 0 : index
    %c0_14 = arith.constant 0 : index
    %19 = vector.load %arg7[%c0_13, %c0_14] : memref<1x128xf32, #tpu.memory_space<vmem>>, vector<1x128xf32>
    %20 = vector.broadcast %19 : vector<1x128xf32> to vector<8x128xf32>
    %21 = arith.addf %18, %20 : vector<8x128xf32>
    %22 = math.tanh %21 : vector<8x128xf32>
    %23 = arith.addf %22, %1 : vector<8x128xf32>
    %24 = arith.addf %23, %7 : vector<8x128xf32>
    %c0_15 = arith.constant 0 : index
    %c0_16 = arith.constant 0 : index
    %25 = vector.load %arg8[%c0_15, %c0_16] : memref<8x128xf32, #tpu.memory_space<vmem>>, vector<8x128xf32>
    tpu.vector_store %arg8[%c0_15, %c0_16], %24 {strides = array<i32>} : memref<8x128xf32, #tpu.memory_space<vmem>>, vector<8x128xf32>,
    return
  }
  func.func @transform_0(%arg0: i32) -> (i32, i32) {
    %c0_i32 = arith.constant 0 : i32
    %c0_i32_0 = arith.constant 0 : i32
    return %arg0, %c0_i32 : i32, i32
  }
  func.func @transform_1(%arg0: i32) -> (i32, i32) {
    %c0_i32 = arith.constant 0 : i32
    %c0_i32_0 = arith.constant 0 : i32
    %c0_i32_1 = arith.constant 0 : i32
    return %c0_i32, %c0_i32_0 : i32, i32
  }
  func.func @transform_2(%arg0: i32) -> (i32, i32) {
    %c0_i32 = arith.constant 0 : i32
    %c0_i32_0 = arith.constant 0 : i32
    %c0_i32_1 = arith.constant 0 : i32
    return %c0_i32, %c0_i32_0 : i32, i32
  }
  func.func @transform_3(%arg0: i32) -> (i32, i32) {
    %c0_i32 = arith.constant 0 : i32
    %c0_i32_0 = arith.constant 0 : i32
    %c0_i32_1 = arith.constant 0 : i32
    return %c0_i32, %c0_i32_0 : i32, i32
  }
  func.func @transform_4(%arg0: i32) -> (i32, i32) {
    %c0_i32 = arith.constant 0 : i32
    %c0_i32_0 = arith.constant 0 : i32
    %c0_i32_1 = arith.constant 0 : i32
    return %c0_i32, %c0_i32_0 : i32, i32
  }
  func.func @transform_5(%arg0: i32) -> (i32, i32) {
    %c0_i32 = arith.constant 0 : i32
    %c0_i32_0 = arith.constant 0 : i32
    %c0_i32_1 = arith.constant 0 : i32
    return %c0_i32, %c0_i32_0 : i32, i32
  }
  func.func @transform_6(%arg0: i32) -> (i32, i32) {
    %c0_i32 = arith.constant 0 : i32
    %c0_i32_0 = arith.constant 0 : i32
    %c0_i32_1 = arith.constant 0 : i32
    return %c0_i32, %c0_i32_0 : i32, i32
  }
  func.func @transform_7(%arg0: i32) -> (i32, i32) {
    %c0_i32 = arith.constant 0 : i32
    %c0_i32_0 = arith.constant 0 : i32
    return %arg0, %c0_i32 : i32, i32
  }
}

module attributes {stable_mosaic.version = 11 : i64} {
  func.func @_fused_dnn_kernel(%arg0: i32, %arg1: memref<8x128xbf16, #tpu.memory_space<vmem>>, %arg2: memref<128x128xbf16, #tpu.memory_space<vmem>>, %arg3: memref<128x128xbf16, #tpu.memory_space<vmem>>, %arg4: memref<128x128xbf16, #tpu.memory_space<vmem>>, %arg5: memref<1x128xf32, #tpu.memory_space<vmem>>, %arg6: memref<1x128xf32, #tpu.memory_space<vmem>>, %arg7: memref<1x128xf32, #tpu.memory_space<vmem>>, %arg8: memref<8x128xf32, #tpu.memory_space<vmem>>) attributes {dimension_semantics = [#tpu.dimension_semantics<parallel>], iteration_bounds = array<i64: 1>, scalar_prefetch = 0 : i64, scratch_operands = 0 : i64, tpu.core_type = #tpu.core_type<tc>, window_params = [{transform_indices = @transform_0, window_bounds = array<i64: 8, 128>}, {pipeline_mode = #tpu.pipeline_mode<synchronous>, transform_indices = @transform_1, window_bounds = array<i64: 128, 128>}, {pipeline_mode = #tpu.pipeline_mode<synchronous>, transform_indices = @transform_2, window_bounds = array<i64: 128, 128>}, {pipeline_mode = #tpu.pipeline_mode<synchronous>, transform_indices = @transform_3, window_bounds = array<i64: 128, 128>}, {pipeline_mode = #tpu.pipeline_mode<synchronous>, transform_indices = @transform_4, window_bounds = array<i64: 1, 128>}, {pipeline_mode = #tpu.pipeline_mode<synchronous>, transform_indices = @transform_5, window_bounds = array<i64: 1, 128>}, {pipeline_mode = #tpu.pipeline_mode<synchronous>, transform_indices = @transform_6, window_bounds = array<i64: 1, 128>}, {transform_indices = @transform_7, window_bounds = array<i64: 8, 128>}]} {
    %c0 = arith.constant 0 : index
    %c0_0 = arith.constant 0 : index
    %0 = vector.load %arg1[%c0, %c0_0] : memref<8x128xbf16, #tpu.memory_space<vmem>>, vector<8x128xbf16>
    %1 = arith.extf %0 : vector<8x128xbf16> to vector<8x128xf32>
    %c0_1 = arith.constant 0 : index
    %c0_2 = arith.constant 0 : index
    %2 = vector.load %arg2[%c0_1, %c0_2] : memref<128x128xbf16, #tpu.memory_space<vmem>>, vector<128x128xbf16>
    %cst = arith.constant dense<0.000000e+00> : vector<8x128xf32>
    %3 = tpu.matmul %0, %2, %cst {dimension_numbers = #tpu.dot_dimension_numbers<[1], [0], [0], [1], [0, 0, 1, 1], [], []>} : vector<8x128xbf16>, vector<128x128xbf16>, vector<8x128xf32> -> vector<8x128xf32>
    %c0_3 = arith.constant 0 : index
    %c0_4 = arith.constant 0 : index
    %4 = vector.load %arg5[%c0_3, %c0_4] : memref<1x128xf32, #tpu.memory_space<vmem>>, vector<1x128xf32>
    %5 = vector.broadcast %4 : vector<1x128xf32> to vector<8x128xf32>
    %6 = arith.addf %3, %5 : vector<8x128xf32>
    %7 = math.tanh %6 : vector<8x128xf32>
    %c0_5 = arith.constant 0 : index
    %c0_6 = arith.constant 0 : index
    %8 = vector.load %arg3[%c0_5, %c0_6] : memref<128x128xbf16, #tpu.memory_space<vmem>>, vector<128x128xbf16>
    %9 = arith.truncf %7 : vector<8x128xf32> to vector<8x128xbf16>
    %cst_7 = arith.constant dense<0.000000e+00> : vector<8x128xf32>
    %10 = tpu.matmul %9, %8, %cst_7 {dimension_numbers = #tpu.dot_dimension_numbers<[1], [0], [0], [1], [0, 0, 1, 1], [], []>} : vector<8x128xbf16>, vector<128x128xbf16>, vector<8x128xf32> -> vector<8x128xf32>
    %c0_8 = arith.constant 0 : index
    %c0_9 = arith.constant 0 : index
    %11 = vector.load %arg6[%c0_8, %c0_9] : memref<1x128xf32, #tpu.memory_space<vmem>>, vector<1x128xf32>
    %12 = vector.broadcast %11 : vector<1x128xf32> to vector<8x128xf32>
    %13 = arith.addf %10, %12 : vector<8x128xf32>
    %14 = math.tanh %13 : vector<8x128xf32>
    %15 = arith.addf %14, %1 : vector<8x128xf32>
    %c0_10 = arith.constant 0 : index
    %c0_11 = arith.constant 0 : index
    %16 = vector.load %arg4[%c0_10, %c0_11] : memref<128x128xbf16, #tpu.memory_space<vmem>>, vector<128x128xbf16>
    %17 = arith.truncf %15 : vector<8x128xf32> to vector<8x128xbf16>
    %cst_12 = arith.constant dense<0.000000e+00> : vector<8x128xf32>
    %18 = tpu.matmul %17, %16, %cst_12 {dimension_numbers = #tpu.dot_dimension_numbers<[1], [0], [0], [1], [0, 0, 1, 1], [], []>} : vector<8x128xbf16>, vector<128x128xbf16>, vector<8x128xf32> -> vector<8x128xf32>
    %c0_13 = arith.constant 0 : index
    %c0_14 = arith.constant 0 : index
    %19 = vector.load %arg7[%c0_13, %c0_14] : memref<1x128xf32, #tpu.memory_space<vmem>>, vector<1x128xf32>
    %20 = vector.broadcast %19 : vector<1x128xf32> to vector<8x128xf32>
    %21 = arith.addf %18, %20 : vector<8x128xf32>
    %22 = math.tanh %21 : vector<8x128xf32>
    %23 = arith.addf %22, %1 : vector<8x128xf32>
    %24 = arith.addf %23, %7 : vector<8x128xf32>
    %c0_15 = arith.constant 0 : index
    %c0_16 = arith.constant 0 : index
    %25 = vector.load %arg8[%c0_15, %c0_16] : memref<8x128xf32, #tpu.memory_space<vmem>>, vector<8x128xf32>
    tpu.vector_store %arg8[%c0_15, %c0_16], %24 {strides = array<i32>} : memref<8x128xf32, #tpu.memory_space<vmem>>, vector<8x128xf32>,
    return
  }
  func.func @transform_0(%arg0: i32) -> (i32, i32) {
    %c0_i32 = arith.constant 0 : i32
    %c0_i32_0 = arith.constant 0 : i32
    return %arg0, %c0_i32 : i32, i32
  }
  func.func @transform_1(%arg0: i32) -> (i32, i32) {
    %c0_i32 = arith.constant 0 : i32
    %c0_i32_0 = arith.constant 0 : i32
    %c0_i32_1 = arith.constant 0 : i32
    return %c0_i32, %c0_i32_0 : i32, i32
  }
  func.func @transform_2(%arg0: i32) -> (i32, i32) {
    %c0_i32 = arith.constant 0 : i32
    %c0_i32_0 = arith.constant 0 : i32
    %c0_i32_1 = arith.constant 0 : i32
    return %c0_i32, %c0_i32_0 : i32, i32
  }
  func.func @transform_3(%arg0: i32) -> (i32, i32) {
    %c0_i32 = arith.constant 0 : i32
    %c0_i32_0 = arith.constant 0 : i32
    %c0_i32_1 = arith.constant 0 : i32
    return %c0_i32, %c0_i32_0 : i32, i32
  }
  func.func @transform_4(%arg0: i32) -> (i32, i32) {
    %c0_i32 = arith.constant 0 : i32
    %c0_i32_0 = arith.constant 0 : i32
    %c0_i32_1 = arith.constant 0 : i32
    return %c0_i32, %c0_i32_0 : i32, i32
  }
  func.func @transform_5(%arg0: i32) -> (i32, i32) {
    %c0_i32 = arith.constant 0 : i32
    %c0_i32_0 = arith.constant 0 : i32
    %c0_i32_1 = arith.constant 0 : i32
    return %c0_i32, %c0_i32_0 : i32, i32
  }
  func.func @transform_6(%arg0: i32) -> (i32, i32) {
    %c0_i32 = arith.constant 0 : i32
    %c0_i32_0 = arith.constant 0 : i32
    %c0_i32_1 = arith.constant 0 : i32
    return %c0_i32, %c0_i32_0 : i32, i32
  }
  func.func @transform_7(%arg0: i32) -> (i32, i32) {
    %c0_i32 = arith.constant 0 : i32
    %c0_i32_0 = arith.constant 0 : i32
    return %arg0, %c0_i32 : i32, i32
  }
}

</mosaic_0001>

<bundles_post_ra>
// kernel: tpu_custom_call.1
= control target key start
LH: loop header
LB: loop body
LE: loop exit
PB: predicated region body
PF: predicated region fallthrough
CT: control target
= control target key end

     0   :  { %12 = vsyncpa [#allocation3], 0  ;;  %s874_s0 = inlined_call_operand.hbm [shape: bf16[8,128], index: 0, kind: input, shape index: {}]   ;;  %s875_s1 = inlined_call_operand.hbm [shape: bf16[128,128], index: 1, kind: input, shape index: {}]   ;;  %s876_s2 = inlined_call_operand.hbm [shape: bf16[128,128], index: 2, kind: input, shape index: {}]   ;;  %s877_s3 = inlined_call_operand.hbm [shape: bf16[128,128], index: 3, kind: input, shape index: {}]   ;;  %s878_s4 = inlined_call_operand.vmem [shape: f32[1,128], index: 4, kind: input, shape index: {}]   ;;  %s879_s5 = inlined_call_operand.vmem [shape: f32[1,128], index: 5, kind: input, shape index: {}]   ;;  %s880_s6 = inlined_call_operand.vmem [shape: f32[1,128], index: 6, kind: input, shape index: {}]   ;;  %s881_s7 = inlined_call_operand.hbm [shape: f32[8,128], index: 7, kind: output, shape index: {}]  }
   0x1   :  { %13 = vsyncpa [#allocation6], 0 }
   0x2   :  { %14 = vsyncpa [#allocation9], 0 }
   0x3   :  { %15 = vsyncpa [#allocation4], 0  ;;  %s713_s24 = smov [#allocation5]   ;;  %s595_s28 = scalar_lea.hbm %s875_s1, 1024 }
   0x4   :  { %s31_s25 = sshll.u32 %s713_s24, 4  ;;  %p596_p0 = scmp.ne.s32.totalorder %s875_s1, %s595_s28  ;;  %s32_s25 = int_to_ptr.vmem [resolvable:$true] %s31_s25 }
   0x5   :  { %p599_p1 = scmp.lt.u32.totalorder %s595_s28, %s875_s1 }
   0x7   :  { %p601_p2 = pnand %p599_p1, %p596_p0 }
   0x9   :  { %604 = shalt.err (!%p601_p2)
}
   0xa   :  { %s605_s10 = scalar_lea.vmem %s32_s25, 1024  ;;  %p610_p4 = scmp.lt.s32.totalorder %s32_s25, %s32_s25 }
   0xb   :  { %p606_p3 = scmp.ne.s32.totalorder %s32_s25, %s605_s10  ;;  %p611_p5 = scmp.lt.s32.totalorder %s605_s10, %s605_s10 }
   0xd   :  { %p612_p6 = por %p611_p5, %p610_p4 }
   0xf   :  { %p613_p7 = pnand %p612_p6, %p606_p3 }
  0x11   :  { %616 = shalt.err (!%p613_p7)
}
  0x12   :  { %s714_s11 = smov 64   ;;  %s715_s12 = smov 4  }
  0x13   :  { %37 = dma.hbm_to_vmem [thread:$0]  %s875_s1, 1024, %s32_s25, [#allocation6], %s714_s11, %s714_s11, %s715_s12  }
  0x14   :  { %s716_s15 = smov [#allocation2]   ;;  %s717_s17 = smov [#allocation7]  }
  0x15   :  { %s22_s16 = sshll.u32 %s716_s15, 4  ;;  %s43_s18 = sshll.u32 %s717_s17, 4  ;;  %s23_s16 = int_to_ptr.vmem [resolvable:$true] %s22_s16  ;;  %s44_s18 = int_to_ptr.vmem [resolvable:$true] %s43_s18 }
  0x16   :  { %s617_s21 = scalar_lea.hbm %s874_s0, 64 }
  0x17   :  { %p618_p8 = scmp.ne.s32.totalorder %s874_s0, %s617_s21  ;;  %p621_p9 = scmp.lt.u32.totalorder %s617_s21, %s874_s0 }
  0x19   :  { %p623_p10 = pnand %p621_p9, %p618_p8 }
  0x1b   :  { %626 = shalt.err (!%p623_p10)
}
  0x1c   :  { %s627_s1 = scalar_lea.vmem %s23_s16, 64  ;;  %p632_p12 = scmp.lt.s32.totalorder %s23_s16, %s23_s16 }
  0x1d   :  { %p628_p11 = scmp.ne.s32.totalorder %s23_s16, %s627_s1  ;;  %p633_p13 = scmp.lt.s32.totalorder %s627_s1, %s627_s1 }
  0x1f   :  { %p634_p0 = por %p633_p13, %p632_p12 }
  0x21   :  { %p635_p1 = pnand %p634_p0, %p628_p11 }
  0x23   :  { %638 = shalt.err (!%p635_p1)
}
  0x24   :  { %25 = dma.hbm_to_vmem [thread:$0]  %s874_s0, 64, %s23_s16, [#allocation3]  }
  0x25   :  { %s639_s30 = scalar_lea.hbm %s876_s2, 1024 }
  0x26   :  { %p640_p2 = scmp.ne.s32.totalorder %s876_s2, %s639_s30  ;;  %p643_p3 = scmp.lt.u32.totalorder %s639_s30, %s876_s2 }
  0x28   :  { %p645_p4 = pnand %p643_p3, %p640_p2 }
  0x2a   :  { %648 = shalt.err (!%p645_p4)
}
  0x2b   :  { %s649_s14 = scalar_lea.vmem %s44_s18, 1024  ;;  %p654_p6 = scmp.lt.s32.totalorder %s44_s18, %s44_s18 }
  0x2c   :  { %p650_p5 = scmp.ne.s32.totalorder %s44_s18, %s649_s14  ;;  %p655_p7 = scmp.lt.s32.totalorder %s649_s14, %s649_s14 }
  0x2e   :  { %p656_p8 = por %p655_p7, %p654_p6 }
  0x30   :  { %p657_p9 = pnand %p656_p8, %p650_p5 }
  0x32   :  { %660 = shalt.err (!%p657_p9)
}
  0x33   :  { %49 = dma.hbm_to_vmem [thread:$0]  %s876_s2, 1024, %s44_s18, [#allocation6], %s714_s11, %s714_s11, %s715_s12  }
  0x34   :  { %s718_s16 = smov [#allocation8]   ;;  %s661_s21 = scalar_lea.hbm %s877_s3, 1024 }
  0x35   :  { %s55_s17 = sshll.u32 %s718_s16, 4  ;;  %p662_p10 = scmp.ne.s32.totalorder %s877_s3, %s661_s21  ;;  %s56_s17 = int_to_ptr.vmem [resolvable:$true] %s55_s17 }
  0x36   :  { %p665_p11 = scmp.lt.u32.totalorder %s661_s21, %s877_s3 }
  0x38   :  { %p667_p12 = pnand %p665_p11, %p662_p10 }
  0x3a   :  { %670 = shalt.err (!%p667_p12)
}
  0x3b   :  { %s671_s1 = scalar_lea.vmem %s56_s17, 1024  ;;  %p676_p0 = scmp.lt.s32.totalorder %s56_s17, %s56_s17 }
  0x3c   :  { %p672_p13 = scmp.ne.s32.totalorder %s56_s17, %s671_s1  ;;  %p677_p1 = scmp.lt.s32.totalorder %s671_s1, %s671_s1 }
  0x3e   :  { %p678_p2 = por %p677_p1, %p676_p0 }
  0x40   :  { %p679_p3 = pnand %p678_p2, %p672_p13 }
  0x42   :  { %682 = shalt.err (!%p679_p3)
}
  0x43   :  { %61 = dma.hbm_to_vmem [thread:$0]  %s877_s3, 1024, %s56_s17, [#allocation9], %s714_s11, %s714_s11, %s715_s12  }
  0x44   :  { %705 = dma.done.wait [#allocation3], 64  }
  0x45   :  { %706 = vsyncadd [#allocation3], 4294967232 }
  0x46   :  { %707 = dma.done.wait [#allocation6], 2048  }
  0x47   :  { %708 = vsyncadd [#allocation6], 4294965248 }
  0x48   :  { %709 = dma.done.wait [#allocation9], 1024  }
  0x49   :  { %710 = vsyncadd [#allocation9], 4294966272  ;;  %v719_v0 = vmov 0.0   ;;  %vm720_vm0 = vmmov 0   ;;  %v565_v1 = vld [vmem:[#allocation5] sm:$0xff]   ;;  %v566_v2 = vld [vmem:[#allocation5 + $0x8] sm:$0xff]  }
  0x4a   :  { %496 = vmatprep.subr.bf16.mxu0 %v719_v0  ;;  %512 = vmatprep.mubr.msk.bf16.mxu0 %vm720_vm0, %v719_v0  ;;  %v567_v3 = vld [vmem:[#allocation5 + $0x10] sm:$0xff]   ;;  %v573_v4 = vld [vmem:[#allocation7] sm:$0xff]   ;;  %v568_v5 = vld [vmem:[#allocation5 + $0x18] sm:$0xff]  }
  0x4b   :  { %516 = vmatprep.subr.bf16.mxu1 %v719_v0  ;;  %532 = vmatprep.mubr.msk.bf16.mxu1 %vm720_vm0, %v719_v0  ;;  %v574_v6 = vld [vmem:[#allocation7 + $0x8] sm:$0xff]   ;;  %v569_v7 = vld [vmem:[#allocation5 + $0x20] sm:$0xff]   ;;  %v575_v8 = vld [vmem:[#allocation7 + $0x10] sm:$0xff]  }
  0x4c   :  { %497 = vmatpush3.bf16.msra.mxu0 %v565_v1  ;;  %517 = vmatpush3.bf16.msra.mxu1 %v573_v4  ;;  %v570_v9 = vld [vmem:[#allocation5 + $0x28] sm:$0xff]   ;;  %v576_v10 = vld [vmem:[#allocation7 + $0x18] sm:$0xff]   ;;  %v571_v11 = vld [vmem:[#allocation5 + $0x30] sm:$0xff]  }
  0x4d   :  { %498 = vmatprep.subr.bf16.mxu0 %v719_v0  ;;  %518 = vmatprep.subr.bf16.mxu1 %v719_v0  ;;  %v572_v12 = vld [vmem:[#allocation5 + $0x38] sm:$0xff]   ;;  %v577_v14 = vld [vmem:[#allocation7 + $0x20] sm:$0xff]   ;;  %v578_v15 = vld [vmem:[#allocation7 + $0x28] sm:$0xff]  }
  0x4e   :  { %v836_v13 = vld [vmem:[#allocation2] sm:$0xf]  ;;  %v579_v16 = vld [vmem:[#allocation7 + $0x30] sm:$0xff]   ;;  %v581_v18 = vld [vmem:[#allocation8] sm:$0xff]  }
  0x4f   :  { %v580_v17 = vld [vmem:[#allocation7 + $0x38] sm:$0xff]   ;;  %v582_v19 = vld [vmem:[#allocation8 + $0x8] sm:$0xff]   ;;  %v583_v20 = vld [vmem:[#allocation8 + $0x10] sm:$0xff]   ;;  %v82_v40 = vunpack.c.l.bf16 %v836_v13 }
  0x50   :  { %499 = vmatpush3.bf16.msra.mxu0 %v566_v2  ;;  %519 = vmatpush3.bf16.msra.mxu1 %v574_v6  ;;  %v584_v21 = vld [vmem:[#allocation8 + $0x18] sm:$0xff]   ;;  %v585_v30 = vld [vmem:[#allocation8 + $0x20] sm:$0xff]   ;;  %v586_v31 = vld [vmem:[#allocation8 + $0x28] sm:$0xff]  }
  0x51   :  { %500 = vmatprep.subr.bf16.mxu0 %v719_v0  ;;  %520 = vmatprep.subr.bf16.mxu1 %v719_v0  ;;  %v442_v22 = vld [vmem:[%s878_s4] ss:$0 sm:$0xff]  ;;  %v587_v32 = vld [vmem:[#allocation8 + $0x30] sm:$0xff]  }
  0x52   :  { %v588_v33 = vld [vmem:[#allocation8 + $0x38] sm:$0xff]  }
  0x53   :  { %v451_v34 = vld [vmem:[%s879_s5] ss:$0 sm:$0xff]  ;;  %s721_s5 = smov [#allocation10]  }
  0x54   :  { %501 = vmatpush3.bf16.msra.mxu0 %v567_v3  ;;  %521 = vmatpush3.bf16.msra.mxu1 %v575_v8  ;;  %v460_v44 = vld [vmem:[%s880_s6] ss:$0 sm:$0xff]  ;;  %s431_s28 = sshll.u32 %s721_s5, 4  ;;  %s432_s28 = int_to_ptr.vmem [resolvable:$true] %s431_s28 }
  0x55   :  { %502 = vmatprep.subr.bf16.mxu0 %v719_v0  ;;  %522 = vmatprep.subr.bf16.mxu1 %v719_v0  ;;  %s683_s29 = scalar_lea.vmem %s432_s28, 128  ;;  %p688_p5 = scmp.lt.s32.totalorder %s432_s28, %s432_s28 }
  0x56   :  { %p684_p4 = scmp.ne.s32.totalorder %s432_s28, %s683_s29  ;;  %p689_p6 = scmp.lt.s32.totalorder %s683_s29, %s683_s29 }
  0x58   :  { %503 = vmatpush3.bf16.msra.mxu0 %v568_v5  ;;  %523 = vmatpush3.bf16.msra.mxu1 %v576_v10  ;;  %p690_p7 = por %p689_p6, %p688_p5 }
  0x59   :  { %504 = vmatprep.subr.bf16.mxu0 %v719_v0  ;;  %524 = vmatprep.subr.bf16.mxu1 %v719_v0 }
  0x5a   :  { %p691_p8 = pnand %p690_p7, %p684_p4 }
  0x5c   :  { %505 = vmatpush3.bf16.msra.mxu0 %v569_v7  ;;  %525 = vmatpush3.bf16.msra.mxu1 %v577_v14 }
  0x5d   :  { %506 = vmatprep.subr.bf16.mxu0 %v719_v0  ;;  %526 = vmatprep.subr.bf16.mxu1 %v719_v0 }
  0x60   :  { %507 = vmatpush3.bf16.msra.mxu0 %v570_v9  ;;  %527 = vmatpush3.bf16.msra.mxu1 %v578_v15 }
  0x61   :  { %508 = vmatprep.subr.bf16.mxu0 %v719_v0  ;;  %528 = vmatprep.subr.bf16.mxu1 %v719_v0 }
  0x64   :  { %509 = vmatpush3.bf16.msra.mxu0 %v571_v11  ;;  %529 = vmatpush3.bf16.msra.mxu1 %v579_v16 }
  0x65   :  { %510 = vmatprep.subr.bf16.mxu0 %v719_v0  ;;  %530 = vmatprep.subr.bf16.mxu1 %v719_v0 }
  0x68   :  { %511 = vmatpush3.bf16.msra.mxu0 %v572_v12  ;;  %531 = vmatpush3.bf16.msra.mxu1 %v580_v17 }
  0x69   :  { %536 = vmatprep.subr.bf16.mxu0 %v719_v0 }
  0x6b   :  { %513 = vmatmul.mubr.bf16.vlgmr.msra.gmra.mrb[0].mxu0 %v836_v13 }
  0x6c   :  { %552 = vmatprep.mubr.msk.bf16.mxu0 %vm720_vm0, %v719_v0  ;;  %537 = vmatpush3.bf16.msra.mxu0 %v581_v18 }
  0x6d   :  { %538 = vmatprep.subr.bf16.mxu0 %v719_v0 }
  0x70   :  { %539 = vmatpush3.bf16.msra.mxu0 %v582_v19 }
  0x71   :  { %540 = vmatprep.subr.bf16.mxu0 %v719_v0 }
  0x74   :  { %541 = vmatpush3.bf16.msra.mxu0 %v583_v20 }
  0x75   :  { %542 = vmatprep.subr.bf16.mxu0 %v719_v0 }
  0x78   :  { %543 = vmatpush3.bf16.msra.mxu0 %v584_v21 }
  0x79   :  { %544 = vmatprep.subr.bf16.mxu0 %v719_v0 }
  0x7c   :  { %545 = vmatpush3.bf16.msra.mxu0 %v585_v30 }
  0x7d   :  { %546 = vmatprep.subr.bf16.mxu0 %v719_v0 }
  0x80   :  { %547 = vmatpush3.bf16.msra.mxu0 %v586_v31 }
  0x81   :  { %548 = vmatprep.subr.bf16.mxu0 %v719_v0 }
  0x84   :  { %549 = vmatpush3.bf16.msra.mxu0 %v587_v32 }
  0x85   :  { %550 = vmatprep.subr.bf16.mxu0 %v719_v0 }
  0x88   :  { %551 = vmatpush3.bf16.msra.mxu0 %v588_v33 }
 0x13e   :  { %v188_v23 = vpop.f32.mrb[0].mxu0 }
 0x13f   :  { %v189_v24 = vadd.f32 %v442_v22, %v188_v23  ;;  %v514_v25 = vpop.f32.mrb[1].mxu0 }
 0x140   :  { %v191_v26 = vpop.f32.mrb[2].mxu0 }
 0x141   :  { %589 = vtanh.f32 %v189_v24  ;;  %v515_v27 = vpop.f32.mrb[3].mxu0 }
 0x14b   :  { %v590_v28 = vpop.eup %589 }
 0x14c   :  { %v211_v29 = vpack.c.bf16 %v590_v28, %v590_v28 }
 0x14e   :  { %533 = vmatmul.mubr.bf16.vlgmr.msra.gmra.mrb[0].mxu1 %v211_v29 }
 0x221   :  { %v301_v35 = vpop.f32.mrb[0].mxu1 }
 0x222   :  { %v302_v36 = vadd.f32 %v451_v34, %v301_v35  ;;  %v534_v37 = vpop.f32.mrb[1].mxu1 }
 0x223   :  { %v304_v38 = vpop.f32.mrb[2].mxu1 }
 0x224   :  { %591 = vtanh.f32 %v302_v36  ;;  %v535_v39 = vpop.f32.mrb[3].mxu1 }
 0x22e   :  { %v592_v41 = vpop.eup %591 }
 0x22f   :  { %v308_v42 = vadd.f32 %v592_v41, %v82_v40 }
 0x231   :  { %v325_v43 = vpack.c.bf16 %v308_v42, %v308_v42 }
 0x233   :  { %553 = vmatmul.mubr.bf16.vlgmr.msra.gmra.mrb[4].mxu0 %v325_v43 }
 0x306   :  { %v415_v45 = vpop.f32.mrb[4].mxu0 }
 0x307   :  { %v416_v46 = vadd.f32 %v460_v44, %v415_v45  ;;  %v554_v47 = vpop.f32.mrb[5].mxu0 }
 0x308   :  { %v418_v48 = vpop.f32.mrb[6].mxu0 }
 0x309   :  { %593 = vtanh.f32 %v416_v46  ;;  %v555_v49 = vpop.f32.mrb[7].mxu0 }
 0x313   :  { %v594_v50 = vpop.eup %593 }
 0x314   :  { %v422_v51 = vadd.f32 %v594_v50, %v82_v40 }
 0x316   :  { %v423_v52 = vadd.f32 %v590_v28, %v422_v51 }
 0x318   :  { %424 = vst [vmem:[#allocation10] sm:$0xff] %v423_v52 }
 0x319   :  { %694 = shalt.err (!%p691_p8)
}
 0x31a   :  { %s695_s8 = scalar_lea.hbm %s881_s7, 128 }
 0x31b   :  { %p696_p9 = scmp.ne.s32.totalorder %s881_s7, %s695_s8  ;;  %p699_p10 = scmp.lt.u32.totalorder %s695_s8, %s881_s7 }
 0x31d   :  { %p701_p11 = pnand %p699_p10, %p696_p9 }
 0x31f   :  { %704 = shalt.err (!%p701_p11)
}
 0x320   :  { %434 = dma.vmem_to_hbm [thread:$0]  %s432_s28, 128, %s881_s7, [#allocation4]  }
 0x321   :  { %711 = dma.done.wait [#allocation4], 128  }
 0x322   :  { %712 = vsyncadd [#allocation4], 4294967168 }
 0x323   :  { %438 = vsyncpa [#allocation3], 1 }
 0x324   :  { %439 = vsyncpa [#allocation6], 1 }
 0x325   :  { %440 = vsyncpa [#allocation9], 1 }
 0x326   :  { %441 = vsyncpa [#allocation4], 1 }

// kernel: tpu_custom_call.1
= control target key start
LH: loop header
LB: loop body
LE: loop exit
PB: predicated region body
PF: predicated region fallthrough
CT: control target
= control target key end

     0   :  { %12 = vsyncpa [#allocation3], 0  ;;  %s874_s0 = inlined_call_operand.hbm [shape: bf16[8,128], index: 0, kind: input, shape index: {}]   ;;  %s875_s1 = inlined_call_operand.hbm [shape: bf16[128,128], index: 1, kind: input, shape index: {}]   ;;  %s876_s2 = inlined_call_operand.hbm [shape: bf16[128,128], index: 2, kind: input, shape index: {}]   ;;  %s877_s3 = inlined_call_operand.hbm [shape: bf16[128,128], index: 3, kind: input, shape index: {}]   ;;  %s878_s4 = inlined_call_operand.vmem [shape: f32[1,128], index: 4, kind: input, shape index: {}]   ;;  %s879_s5 = inlined_call_operand.vmem [shape: f32[1,128], index: 5, kind: input, shape index: {}]   ;;  %s880_s6 = inlined_call_operand.vmem [shape: f32[1,128], index: 6, kind: input, shape index: {}]   ;;  %s881_s7 = inlined_call_operand.hbm [shape: f32[8,128], index: 7, kind: output, shape index: {}]  }
   0x1   :  { %13 = vsyncpa [#allocation6], 0 }
   0x2   :  { %14 = vsyncpa [#allocation9], 0 }
   0x3   :  { %15 = vsyncpa [#allocation4], 0  ;;  %s713_s24 = smov [#allocation5]   ;;  %s595_s28 = scalar_lea.hbm %s875_s1, 1024 }
   0x4   :  { %s31_s25 = sshll.u32 %s713_s24, 4  ;;  %p596_p0 = scmp.ne.s32.totalorder %s875_s1, %s595_s28  ;;  %s32_s25 = int_to_ptr.vmem [resolvable:$true] %s31_s25 }
   0x5   :  { %p599_p1 = scmp.lt.u32.totalorder %s595_s28, %s875_s1 }
   0x7   :  { %p601_p2 = pnand %p599_p1, %p596_p0 }
   0x9   :  { %604 = shalt.err (!%p601_p2)
}
   0xa   :  { %s605_s10 = scalar_lea.vmem %s32_s25, 1024  ;;  %p610_p4 = scmp.lt.s32.totalorder %s32_s25, %s32_s25 }
   0xb   :  { %p606_p3 = scmp.ne.s32.totalorder %s32_s25, %s605_s10  ;;  %p611_p5 = scmp.lt.s32.totalorder %s605_s10, %s605_s10 }
   0xd   :  { %p612_p6 = por %p611_p5, %p610_p4 }
   0xf   :  { %p613_p7 = pnand %p612_p6, %p606_p3 }
  0x11   :  { %616 = shalt.err (!%p613_p7)
}
  0x12   :  { %s714_s11 = smov 64   ;;  %s715_s12 = smov 4  }
  0x13   :  { %37 = dma.hbm_to_vmem [thread:$0]  %s875_s1, 1024, %s32_s25, [#allocation6], %s714_s11, %s714_s11, %s715_s12  }
  0x14   :  { %s716_s15 = smov [#allocation2]   ;;  %s717_s17 = smov [#allocation7]  }
  0x15   :  { %s22_s16 = sshll.u32 %s716_s15, 4  ;;  %s43_s18 = sshll.u32 %s717_s17, 4  ;;  %s23_s16 = int_to_ptr.vmem [resolvable:$true] %s22_s16  ;;  %s44_s18 = int_to_ptr.vmem [resolvable:$true] %s43_s18 }
  0x16   :  { %s617_s21 = scalar_lea.hbm %s874_s0, 64 }
  0x17   :  { %p618_p8 = scmp.ne.s32.totalorder %s874_s0, %s617_s21  ;;  %p621_p9 = scmp.lt.u32.totalorder %s617_s21, %s874_s0 }
  0x19   :  { %p623_p10 = pnand %p621_p9, %p618_p8 }
  0x1b   :  { %626 = shalt.err (!%p623_p10)
}
  0x1c   :  { %s627_s1 = scalar_lea.vmem %s23_s16, 64  ;;  %p632_p12 = scmp.lt.s32.totalorder %s23_s16, %s23_s16 }
  0x1d   :  { %p628_p11 = scmp.ne.s32.totalorder %s23_s16, %s627_s1  ;;  %p633_p13 = scmp.lt.s32.totalorder %s627_s1, %s627_s1 }
  0x1f   :  { %p634_p0 = por %p633_p13, %p632_p12 }
  0x21   :  { %p635_p1 = pnand %p634_p0, %p628_p11 }
  0x23   :  { %638 = shalt.err (!%p635_p1)
}
  0x24   :  { %25 = dma.hbm_to_vmem [thread:$0]  %s874_s0, 64, %s23_s16, [#allocation3]  }
  0x25   :  { %s639_s30 = scalar_lea.hbm %s876_s2, 1024 }
  0x26   :  { %p640_p2 = scmp.ne.s32.totalorder %s876_s2, %s639_s30  ;;  %p643_p3 = scmp.lt.u32.totalorder %s639_s30, %s876_s2 }
  0x28   :  { %p645_p4 = pnand %p643_p3, %p640_p2 }
  0x2a   :  { %648 = shalt.err (!%p645_p4)
}
  0x2b   :  { %s649_s14 = scalar_lea.vmem %s44_s18, 1024  ;;  %p654_p6 = scmp.lt.s32.totalorder %s44_s18, %s44_s18 }
  0x2c   :  { %p650_p5 = scmp.ne.s32.totalorder %s44_s18, %s649_s14  ;;  %p655_p7 = scmp.lt.s32.totalorder %s649_s14, %s649_s14 }
  0x2e   :  { %p656_p8 = por %p655_p7, %p654_p6 }
  0x30   :  { %p657_p9 = pnand %p656_p8, %p650_p5 }
  0x32   :  { %660 = shalt.err (!%p657_p9)
}
  0x33   :  { %49 = dma.hbm_to_vmem [thread:$0]  %s876_s2, 1024, %s44_s18, [#allocation6], %s714_s11, %s714_s11, %s715_s12  }
  0x34   :  { %s718_s16 = smov [#allocation8]   ;;  %s661_s21 = scalar_lea.hbm %s877_s3, 1024 }
  0x35   :  { %s55_s17 = sshll.u32 %s718_s16, 4  ;;  %p662_p10 = scmp.ne.s32.totalorder %s877_s3, %s661_s21  ;;  %s56_s17 = int_to_ptr.vmem [resolvable:$true] %s55_s17 }
  0x36   :  { %p665_p11 = scmp.lt.u32.totalorder %s661_s21, %s877_s3 }
  0x38   :  { %p667_p12 = pnand %p665_p11, %p662_p10 }
  0x3a   :  { %670 = shalt.err (!%p667_p12)
}
  0x3b   :  { %s671_s1 = scalar_lea.vmem %s56_s17, 1024  ;;  %p676_p0 = scmp.lt.s32.totalorder %s56_s17, %s56_s17 }
  0x3c   :  { %p672_p13 = scmp.ne.s32.totalorder %s56_s17, %s671_s1  ;;  %p677_p1 = scmp.lt.s32.totalorder %s671_s1, %s671_s1 }
  0x3e   :  { %p678_p2 = por %p677_p1, %p676_p0 }
  0x40   :  { %p679_p3 = pnand %p678_p2, %p672_p13 }
  0x42   :  { %682 = shalt.err (!%p679_p3)
}
  0x43   :  { %61 = dma.hbm_to_vmem [thread:$0]  %s877_s3, 1024, %s56_s17, [#allocation9], %s714_s11, %s714_s11, %s715_s12  }
  0x44   :  { %705 = dma.done.wait [#allocation3], 64  }
  0x45   :  { %706 = vsyncadd [#allocation3], 4294967232 }
  0x46   :  { %707 = dma.done.wait [#allocation6], 2048  }
  0x47   :  { %708 = vsyncadd [#allocation6], 4294965248 }
  0x48   :  { %709 = dma.done.wait [#allocation9], 1024  }
  0x49   :  { %710 = vsyncadd [#allocation9], 4294966272  ;;  %v719_v0 = vmov 0.0   ;;  %vm720_vm0 = vmmov 0   ;;  %v565_v1 = vld [vmem:[#allocation5] sm:$0xff]   ;;  %v566_v2 = vld [vmem:[#allocation5 + $0x8] sm:$0xff]  }
  0x4a   :  { %496 = vmatprep.subr.bf16.mxu0 %v719_v0  ;;  %512 = vmatprep.mubr.msk.bf16.mxu0 %vm720_vm0, %v719_v0  ;;  %v567_v3 = vld [vmem:[#allocation5 + $0x10] sm:$0xff]   ;;  %v573_v4 = vld [vmem:[#allocation7] sm:$0xff]   ;;  %v568_v5 = vld [vmem:[#allocation5 + $0x18] sm:$0xff]  }
  0x4b   :  { %516 = vmatprep.subr.bf16.mxu1 %v719_v0  ;;  %532 = vmatprep.mubr.msk.bf16.mxu1 %vm720_vm0, %v719_v0  ;;  %v574_v6 = vld [vmem:[#allocation7 + $0x8] sm:$0xff]   ;;  %v569_v7 = vld [vmem:[#allocation5 + $0x20] sm:$0xff]   ;;  %v575_v8 = vld [vmem:[#allocation7 + $0x10] sm:$0xff]  }
  0x4c   :  { %497 = vmatpush3.bf16.msra.mxu0 %v565_v1  ;;  %517 = vmatpush3.bf16.msra.mxu1 %v573_v4  ;;  %v570_v9 = vld [vmem:[#allocation5 + $0x28] sm:$0xff]   ;;  %v576_v10 = vld [vmem:[#allocation7 + $0x18] sm:$0xff]   ;;  %v571_v11 = vld [vmem:[#allocation5 + $0x30] sm:$0xff]  }
  0x4d   :  { %498 = vmatprep.subr.bf16.mxu0 %v719_v0  ;;  %518 = vmatprep.subr.bf16.mxu1 %v719_v0  ;;  %v572_v12 = vld [vmem:[#allocation5 + $0x38] sm:$0xff]   ;;  %v577_v14 = vld [vmem:[#allocation7 + $0x20] sm:$0xff]   ;;  %v578_v15 = vld [vmem:[#allocation7 + $0x28] sm:$0xff]  }
  0x4e   :  { %v836_v13 = vld [vmem:[#allocation2] sm:$0xf]  ;;  %v579_v16 = vld [vmem:[#allocation7 + $0x30] sm:$0xff]   ;;  %v581_v18 = vld [vmem:[#allocation8] sm:$0xff]  }
  0x4f   :  { %v580_v17 = vld [vmem:[#allocation7 + $0x38] sm:$0xff]   ;;  %v582_v19 = vld [vmem:[#allocation8 + $0x8] sm:$0xff]   ;;  %v583_v20 = vld [vmem:[#allocation8 + $0x10] sm:$0xff]   ;;  %v82_v40 = vunpack.c.l.bf16 %v836_v13 }
  0x50   :  { %499 = vmatpush3.bf16.msra.mxu0 %v566_v2  ;;  %519 = vmatpush3.bf16.msra.mxu1 %v574_v6  ;;  %v584_v21 = vld [vmem:[#allocation8 + $0x18] sm:$0xff]   ;;  %v585_v30 = vld [vmem:[#allocation8 + $0x20] sm:$0xff]   ;;  %v586_v31 = vld [vmem:[#allocation8 + $0x28] sm:$0xff]  }
  0x51   :  { %500 = vmatprep.subr.bf16.mxu0 %v719_v0  ;;  %520 = vmatprep.subr.bf16.mxu1 %v719_v0  ;;  %v442_v22 = vld [vmem:[%s878_s4] ss:$0 sm:$0xff]  ;;  %v587_v32 = vld [vmem:[#allocation8 + $0x30] sm:$0xff]  }
  0x52   :  { %v588_v33 = vld [vmem:[#allocation8 + $0x38] sm:$0xff]  }
  0x53   :  { %v451_v34 = vld [vmem:[%s879_s5] ss:$0 sm:$0xff]  ;;  %s721_s5 = smov [#allocation10]  }
  0x54   :  { %501 = vmatpush3.bf16.msra.mxu0 %v567_v3  ;;  %521 = vmatpush3.bf16.msra.mxu1 %v575_v8  ;;  %v460_v44 = vld [vmem:[%s880_s6] ss:$0 sm:$0xff]  ;;  %s431_s28 = sshll.u32 %s721_s5, 4  ;;  %s432_s28 = int_to_ptr.vmem [resolvable:$true] %s431_s28 }
  0x55   :  { %502 = vmatprep.subr.bf16.mxu0 %v719_v0  ;;  %522 = vmatprep.subr.bf16.mxu1 %v719_v0  ;;  %s683_s29 = scalar_lea.vmem %s432_s28, 128  ;;  %p688_p5 = scmp.lt.s32.totalorder %s432_s28, %s432_s28 }
  0x56   :  { %p684_p4 = scmp.ne.s32.totalorder %s432_s28, %s683_s29  ;;  %p689_p6 = scmp.lt.s32.totalorder %s683_s29, %s683_s29 }
  0x58   :  { %503 = vmatpush3.bf16.msra.mxu0 %v568_v5  ;;  %523 = vmatpush3.bf16.msra.mxu1 %v576_v10  ;;  %p690_p7 = por %p689_p6, %p688_p5 }
  0x59   :  { %504 = vmatprep.subr.bf16.mxu0 %v719_v0  ;;  %524 = vmatprep.subr.bf16.mxu1 %v719_v0 }
  0x5a   :  { %p691_p8 = pnand %p690_p7, %p684_p4 }
  0x5c   :  { %505 = vmatpush3.bf16.msra.mxu0 %v569_v7  ;;  %525 = vmatpush3.bf16.msra.mxu1 %v577_v14 }
  0x5d   :  { %506 = vmatprep.subr.bf16.mxu0 %v719_v0  ;;  %526 = vmatprep.subr.bf16.mxu1 %v719_v0 }
  0x60   :  { %507 = vmatpush3.bf16.msra.mxu0 %v570_v9  ;;  %527 = vmatpush3.bf16.msra.mxu1 %v578_v15 }
  0x61   :  { %508 = vmatprep.subr.bf16.mxu0 %v719_v0  ;;  %528 = vmatprep.subr.bf16.mxu1 %v719_v0 }
  0x64   :  { %509 = vmatpush3.bf16.msra.mxu0 %v571_v11  ;;  %529 = vmatpush3.bf16.msra.mxu1 %v579_v16 }
  0x65   :  { %510 = vmatprep.subr.bf16.mxu0 %v719_v0  ;;  %530 = vmatprep.subr.bf16.mxu1 %v719_v0 }
  0x68   :  { %511 = vmatpush3.bf16.msra.mxu0 %v572_v12  ;;  %531 = vmatpush3.bf16.msra.mxu1 %v580_v17 }
  0x69   :  { %536 = vmatprep.subr.bf16.mxu0 %v719_v0 }
  0x6b   :  { %513 = vmatmul.mubr.bf16.vlgmr.msra.gmra.mrb[0].mxu0 %v836_v13 }
  0x6c   :  { %552 = vmatprep.mubr.msk.bf16.mxu0 %vm720_vm0, %v719_v0  ;;  %537 = vmatpush3.bf16.msra.mxu0 %v581_v18 }
  0x6d   :  { %538 = vmatprep.subr.bf16.mxu0 %v719_v0 }
  0x70   :  { %539 = vmatpush3.bf16.msra.mxu0 %v582_v19 }
  0x71   :  { %540 = vmatprep.subr.bf16.mxu0 %v719_v0 }
  0x74   :  { %541 = vmatpush3.bf16.msra.mxu0 %v583_v20 }
  0x75   :  { %542 = vmatprep.subr.bf16.mxu0 %v719_v0 }
  0x78   :  { %543 = vmatpush3.bf16.msra.mxu0 %v584_v21 }
  0x79   :  { %544 = vmatprep.subr.bf16.mxu0 %v719_v0 }
  0x7c   :  { %545 = vmatpush3.bf16.msra.mxu0 %v585_v30 }
  0x7d   :  { %546 = vmatprep.subr.bf16.mxu0 %v719_v0 }
  0x80   :  { %547 = vmatpush3.bf16.msra.mxu0 %v586_v31 }
  0x81   :  { %548 = vmatprep.subr.bf16.mxu0 %v719_v0 }
  0x84   :  { %549 = vmatpush3.bf16.msra.mxu0 %v587_v32 }
  0x85   :  { %550 = vmatprep.subr.bf16.mxu0 %v719_v0 }
  0x88   :  { %551 = vmatpush3.bf16.msra.mxu0 %v588_v33 }
 0x13e   :  { %v188_v23 = vpop.f32.mrb[0].mxu0 }
 0x13f   :  { %v189_v24 = vadd.f32 %v442_v22, %v188_v23  ;;  %v514_v25 = vpop.f32.mrb[1].mxu0 }
 0x140   :  { %v191_v26 = vpop.f32.mrb[2].mxu0 }
 0x141   :  { %589 = vtanh.f32 %v189_v24  ;;  %v515_v27 = vpop.f32.mrb[3].mxu0 }
 0x14b   :  { %v590_v28 = vpop.eup %589 }
 0x14c   :  { %v211_v29 = vpack.c.bf16 %v590_v28, %v590_v28 }
 0x14e   :  { %533 = vmatmul.mubr.bf16.vlgmr.msra.gmra.mrb[0].mxu1 %v211_v29 }
 0x221   :  { %v301_v35 = vpop.f32.mrb[0].mxu1 }
 0x222   :  { %v302_v36 = vadd.f32 %v451_v34, %v301_v35  ;;  %v534_v37 = vpop.f32.mrb[1].mxu1 }
 0x223   :  { %v304_v38 = vpop.f32.mrb[2].mxu1 }
 0x224   :  { %591 = vtanh.f32 %v302_v36  ;;  %v535_v39 = vpop.f32.mrb[3].mxu1 }
 0x22e   :  { %v592_v41 = vpop.eup %591 }
 0x22f   :  { %v308_v42 = vadd.f32 %v592_v41, %v82_v40 }
 0x231   :  { %v325_v43 = vpack.c.bf16 %v308_v42, %v308_v42 }
 0x233   :  { %553 = vmatmul.mubr.bf16.vlgmr.msra.gmra.mrb[4].mxu0 %v325_v43 }
 0x306   :  { %v415_v45 = vpop.f32.mrb[4].mxu0 }
 0x307   :  { %v416_v46 = vadd.f32 %v460_v44, %v415_v45  ;;  %v554_v47 = vpop.f32.mrb[5].mxu0 }
 0x308   :  { %v418_v48 = vpop.f32.mrb[6].mxu0 }
 0x309   :  { %593 = vtanh.f32 %v416_v46  ;;  %v555_v49 = vpop.f32.mrb[7].mxu0 }
 0x313   :  { %v594_v50 = vpop.eup %593 }
 0x314   :  { %v422_v51 = vadd.f32 %v594_v50, %v82_v40 }
 0x316   :  { %v423_v52 = vadd.f32 %v590_v28, %v422_v51 }
 0x318   :  { %424 = vst [vmem:[#allocation10] sm:$0xff] %v423_v52 }
 0x319   :  { %694 = shalt.err (!%p691_p8)
}
 0x31a   :  { %s695_s8 = scalar_lea.hbm %s881_s7, 128 }
 0x31b   :  { %p696_p9 = scmp.ne.s32.totalorder %s881_s7, %s695_s8  ;;  %p699_p10 = scmp.lt.u32.totalorder %s695_s8, %s881_s7 }
 0x31d   :  { %p701_p11 = pnand %p699_p10, %p696_p9 }
 0x31f   :  { %704 = shalt.err (!%p701_p11)
}
 0x320   :  { %434 = dma.vmem_to_hbm [thread:$0]  %s432_s28, 128, %s881_s7, [#allocation4]  }
 0x321   :  { %711 = dma.done.wait [#allocation4], 128  }
 0x322   :  { %712 = vsyncadd [#allocation4], 4294967168 }
 0x323   :  { %438 = vsyncpa [#allocation3], 1 }
 0x324   :  { %439 = vsyncpa [#allocation6], 1 }
 0x325   :  { %440 = vsyncpa [#allocation9], 1 }
 0x326   :  { %441 = vsyncpa [#allocation4], 1 }

</bundles_post_ra>
